<compile_context>
chip_gen: v7x
topology: tpu7x:2x2x1
jax: 0.10.0
libtpu: 0.0.40
codegen_flags: <defaults>
</compile_context>

<pallas_src>
import jax
import jax.numpy as jnp
import numpy as np
from jax.experimental import pallas as pl
from jax.experimental.pallas import tpu as pltpu


def _round_up(n, m):
    return ((n + m - 1) // m) * m


def _orthogonal(key, shape, gain):
    """Orthogonal init matching torch.nn.init.orthogonal_ semantics."""
    rows, cols = shape
    n = max(rows, cols)
    a = jax.random.normal(key, (n, n), dtype=jnp.float32)
    q, r = jnp.linalg.qr(a)
    q = q * jnp.sign(jnp.diag(r))[None, :]  # sign fix for uniqueness
    return gain * q[:rows, :cols]


def actor_kernel(x_ref, w1_ref, b1_ref, w2_ref, b2_ref, w3_ref, b3_ref, o_ref):
    # One batch tile per grid step: three MXU matmuls + VPU/EUP tanh, all f32.
    x = x_ref[...]
    h1 = jnp.tanh(
        jnp.dot(x, w1_ref[...], preferred_element_type=jnp.float32) + b1_ref[...]
    )
    h2 = jnp.tanh(
        jnp.dot(h1, w2_ref[...], preferred_element_type=jnp.float32) + b2_ref[...]
    )
    # Lane-dense (TB, n_pad) store; real num_actions columns sliced in wrapper.
    o_ref[...] = (
        jnp.dot(h2, w3_ref[...], preferred_element_type=jnp.float32) + b3_ref[...]
    )


def actor_forward(x, params):
    """Returns (action_mean.squeeze(), action_logstd.squeeze()) like Actor.forward."""
    w1, b1, w2, b2, w3, b3, logstd = params
    batch, num_inputs = x.shape
    hidden = w1.shape[1]
    num_actions = w3.shape[1]

    # Lane-dense padding of hidden / output feature dims (multiples of 128).
    h_pad = _round_up(max(hidden, 128), 128)
    n_pad = _round_up(max(num_actions, 128), 128)
    w1p = jnp.pad(w1, ((0, 0), (0, h_pad - hidden)))
    b1p = jnp.pad(b1, ((0, 0), (0, h_pad - hidden)))
    w2p = jnp.pad(w2, ((0, h_pad - hidden), (0, h_pad - hidden)))
    b2p = jnp.pad(b2, ((0, 0), (0, h_pad - hidden)))
    w3p = jnp.pad(w3, ((0, h_pad - hidden), (0, n_pad - num_actions)))
    b3p = jnp.pad(b3, ((0, 0), (0, n_pad - num_actions)))

    # Batch tiling: small batches -> one sublane-aligned tile; large batches ->
    # 512-row tiles (double-buffered, bounded VMEM on all generations).
    tb = min(512, _round_up(batch, 8))
    b_pad = _round_up(batch, tb)
    xp = jnp.pad(x, ((0, b_pad - batch), (0, 0))) if b_pad != batch else x
    grid = (b_pad // tb,)

    out = pl.pallas_call(
        actor_kernel,
        out_shape=jax.ShapeDtypeStruct((b_pad, n_pad), jnp.float32),
        grid=grid,
        in_specs=[
            pl.BlockSpec((tb, num_inputs), lambda i: (i, 0)),     # x: tiled over batch
            pl.BlockSpec((num_inputs, h_pad), lambda i: (0, 0)),  # w1 (resident)
            pl.BlockSpec((1, h_pad), lambda i: (0, 0)),           # b1
            pl.BlockSpec((h_pad, h_pad), lambda i: (0, 0)),       # w2
            pl.BlockSpec((1, h_pad), lambda i: (0, 0)),           # b2
            pl.BlockSpec((h_pad, n_pad), lambda i: (0, 0)),       # w3 (lane-padded)
            pl.BlockSpec((1, n_pad), lambda i: (0, 0)),           # b3 (lane-padded)
        ],
        out_specs=pl.BlockSpec((tb, n_pad), lambda i: (i, 0)),
        compiler_params=pltpu.CompilerParams(
            dimension_semantics=("parallel",),
        ),
    )(xp, w1p, b1p, w2p, b2p, w3p, b3p)

    action_mean = out[:batch, :num_actions]
    # logstd is a learned constant broadcast to the mean's shape (no compute).
    action_logstd = jnp.broadcast_to(logstd, action_mean.shape)
    return jnp.squeeze(action_mean), jnp.squeeze(action_logstd)


def init_actor_params(key, num_inputs, num_actions, hidden_dim):
    k1, k2, k3 = jax.random.split(key, 3)
    std = float(np.sqrt(2.0))
    # Stored as [in, out]; PyTorch Linear weight is [out, in].
    w1 = _orthogonal(k1, (num_inputs, hidden_dim), std)
    b1 = jnp.zeros((1, hidden_dim), jnp.float32)
    w2 = _orthogonal(k2, (hidden_dim, hidden_dim), std)
    b2 = jnp.zeros((1, hidden_dim), jnp.float32)
    w3 = _orthogonal(k3, (hidden_dim, num_actions), 0.01)  # actor head: std=0.01
    b3 = jnp.zeros((1, num_actions), jnp.float32)
    logstd = jnp.zeros((1, num_actions), jnp.float32)
    return (w1, b1, w2, b2, w3, b3, logstd)


def actor_reference(x, params):
    w1, b1, w2, b2, w3, b3, logstd = params
    h1 = jnp.tanh(x @ w1 + b1)
    h2 = jnp.tanh(h1 @ w2 + b2)
    mean = h2 @ w3 + b3
    return jnp.squeeze(mean), jnp.squeeze(jnp.broadcast_to(logstd, mean.shape))


if __name__ == "__main__":
    num_inputs = 8
    num_actions = 4
    hidden_dim = 32
    batch = 4

    key = jax.random.PRNGKey(0)
    kx, kp = jax.random.split(key)
    x = jax.random.normal(kx, (batch, num_inputs), dtype=jnp.float32)
    params = init_actor_params(kp, num_inputs, num_actions, hidden_dim)

    mean, logstd = jax.block_until_ready(actor_forward(x, params))
    ref_mean, ref_logstd = actor_reference(x, params)

    assert mean.shape == (batch, num_actions), mean.shape
    assert logstd.shape == (batch, num_actions), logstd.shape
    np.testing.assert_allclose(np.asarray(mean), np.asarray(ref_mean),
                               rtol=1e-5, atol=1e-5)
    np.testing.assert_allclose(np.asarray(logstd), np.asarray(ref_logstd),
                               rtol=1e-5, atol=1e-5)
    print("KERNEL_OK")
</pallas_src>

<mosaic_0001>
module attributes {stable_mosaic.version = 11 : i64} {
  func.func @actor_kernel(%arg0: i32, %arg1: memref<8x8xf32, #tpu.memory_space<vmem>>, %arg2: memref<8x128xf32, #tpu.memory_space<vmem>>, %arg3: memref<1x128xf32, #tpu.memory_space<vmem>>, %arg4: memref<128x128xf32, #tpu.memory_space<vmem>>, %arg5: memref<1x128xf32, #tpu.memory_space<vmem>>, %arg6: memref<128x128xf32, #tpu.memory_space<vmem>>, %arg7: memref<1x128xf32, #tpu.memory_space<vmem>>, %arg8: memref<8x128xf32, #tpu.memory_space<vmem>>) attributes {dimension_semantics = [#tpu.dimension_semantics<parallel>], iteration_bounds = array<i64: 1>, scalar_prefetch = 0 : i64, scratch_operands = 0 : i64, tpu.core_type = #tpu.core_type<tc>, window_params = [{transform_indices = @transform_0, window_bounds = array<i64: 8, 8>}, {pipeline_mode = #tpu.pipeline_mode<synchronous>, transform_indices = @transform_1, window_bounds = array<i64: 8, 128>}, {pipeline_mode = #tpu.pipeline_mode<synchronous>, transform_indices = @transform_2, window_bounds = array<i64: 1, 128>}, {pipeline_mode = #tpu.pipeline_mode<synchronous>, transform_indices = @transform_3, window_bounds = array<i64: 128, 128>}, {pipeline_mode = #tpu.pipeline_mode<synchronous>, transform_indices = @transform_4, window_bounds = array<i64: 1, 128>}, {pipeline_mode = #tpu.pipeline_mode<synchronous>, transform_indices = @transform_5, window_bounds = array<i64: 128, 128>}, {pipeline_mode = #tpu.pipeline_mode<synchronous>, transform_indices = @transform_6, window_bounds = array<i64: 1, 128>}, {transform_indices = @transform_7, window_bounds = array<i64: 8, 128>}]} {
    %c0 = arith.constant 0 : index
    %c0_0 = arith.constant 0 : index
    %0 = vector.load %arg1[%c0, %c0_0] : memref<8x8xf32, #tpu.memory_space<vmem>>, vector<8x8xf32>
    %c0_1 = arith.constant 0 : index
    %c0_2 = arith.constant 0 : index
    %1 = vector.load %arg2[%c0_1, %c0_2] : memref<8x128xf32, #tpu.memory_space<vmem>>, vector<8x128xf32>
    %cst = arith.constant dense<0.000000e+00> : vector<8x128xf32>
    %2 = tpu.matmul %0, %1, %cst {dimension_numbers = #tpu.dot_dimension_numbers<[1], [0], [0], [1], [0, 0, 1, 1], [], []>} : vector<8x8xf32>, vector<8x128xf32>, vector<8x128xf32> -> vector<8x128xf32>
    %c0_3 = arith.constant 0 : index
    %c0_4 = arith.constant 0 : index
    %3 = vector.load %arg3[%c0_3, %c0_4] : memref<1x128xf32, #tpu.memory_space<vmem>>, vector<1x128xf32>
    %4 = vector.broadcast %3 : vector<1x128xf32> to vector<8x128xf32>
    %5 = arith.addf %2, %4 : vector<8x128xf32>
    %6 = math.tanh %5 : vector<8x128xf32>
    %c0_5 = arith.constant 0 : index
    %c0_6 = arith.constant 0 : index
    %7 = vector.load %arg4[%c0_5, %c0_6] : memref<128x128xf32, #tpu.memory_space<vmem>>, vector<128x128xf32>
    %cst_7 = arith.constant dense<0.000000e+00> : vector<8x128xf32>
    %8 = tpu.matmul %6, %7, %cst_7 {dimension_numbers = #tpu.dot_dimension_numbers<[1], [0], [0], [1], [0, 0, 1, 1], [], []>} : vector<8x128xf32>, vector<128x128xf32>, vector<8x128xf32> -> vector<8x128xf32>
    %c0_8 = arith.constant 0 : index
    %c0_9 = arith.constant 0 : index
    %9 = vector.load %arg5[%c0_8, %c0_9] : memref<1x128xf32, #tpu.memory_space<vmem>>, vector<1x128xf32>
    %10 = vector.broadcast %9 : vector<1x128xf32> to vector<8x128xf32>
    %11 = arith.addf %8, %10 : vector<8x128xf32>
    %12 = math.tanh %11 : vector<8x128xf32>
    %c0_10 = arith.constant 0 : index
    %c0_11 = arith.constant 0 : index
    %13 = vector.load %arg6[%c0_10, %c0_11] : memref<128x128xf32, #tpu.memory_space<vmem>>, vector<128x128xf32>
    %cst_12 = arith.constant dense<0.000000e+00> : vector<8x128xf32>
    %14 = tpu.matmul %12, %13, %cst_12 {dimension_numbers = #tpu.dot_dimension_numbers<[1], [0], [0], [1], [0, 0, 1, 1], [], []>} : vector<8x128xf32>, vector<128x128xf32>, vector<8x128xf32> -> vector<8x128xf32>
    %c0_13 = arith.constant 0 : index
    %c0_14 = arith.constant 0 : index
    %15 = vector.load %arg7[%c0_13, %c0_14] : memref<1x128xf32, #tpu.memory_space<vmem>>, vector<1x128xf32>
    %16 = vector.broadcast %15 : vector<1x128xf32> to vector<8x128xf32>
    %17 = arith.addf %14, %16 : vector<8x128xf32>
    %c0_15 = arith.constant 0 : index
    %c0_16 = arith.constant 0 : index
    %18 = vector.load %arg8[%c0_15, %c0_16] : memref<8x128xf32, #tpu.memory_space<vmem>>, vector<8x128xf32>
    tpu.vector_store %arg8[%c0_15, %c0_16], %17 {strides = array<i32>} : memref<8x128xf32, #tpu.memory_space<vmem>>, vector<8x128xf32>,
    return
  }
  func.func @transform_0(%arg0: i32) -> (i32, i32) {
    %c0_i32 = arith.constant 0 : i32
    %c0_i32_0 = arith.constant 0 : i32
    return %arg0, %c0_i32 : i32, i32
  }
  func.func @transform_1(%arg0: i32) -> (i32, i32) {
    %c0_i32 = arith.constant 0 : i32
    %c0_i32_0 = arith.constant 0 : i32
    %c0_i32_1 = arith.constant 0 : i32
    return %c0_i32, %c0_i32_0 : i32, i32
  }
  func.func @transform_2(%arg0: i32) -> (i32, i32) {
    %c0_i32 = arith.constant 0 : i32
    %c0_i32_0 = arith.constant 0 : i32
    %c0_i32_1 = arith.constant 0 : i32
    return %c0_i32, %c0_i32_0 : i32, i32
  }
  func.func @transform_3(%arg0: i32) -> (i32, i32) {
    %c0_i32 = arith.constant 0 : i32
    %c0_i32_0 = arith.constant 0 : i32
    %c0_i32_1 = arith.constant 0 : i32
    return %c0_i32, %c0_i32_0 : i32, i32
  }
  func.func @transform_4(%arg0: i32) -> (i32, i32) {
    %c0_i32 = arith.constant 0 : i32
    %c0_i32_0 = arith.constant 0 : i32
    %c0_i32_1 = arith.constant 0 : i32
    return %c0_i32, %c0_i32_0 : i32, i32
  }
  func.func @transform_5(%arg0: i32) -> (i32, i32) {
    %c0_i32 = arith.constant 0 : i32
    %c0_i32_0 = arith.constant 0 : i32
    %c0_i32_1 = arith.constant 0 : i32
    return %c0_i32, %c0_i32_0 : i32, i32
  }
  func.func @transform_6(%arg0: i32) -> (i32, i32) {
    %c0_i32 = arith.constant 0 : i32
    %c0_i32_0 = arith.constant 0 : i32
    %c0_i32_1 = arith.constant 0 : i32
    return %c0_i32, %c0_i32_0 : i32, i32
  }
  func.func @transform_7(%arg0: i32) -> (i32, i32) {
    %c0_i32 = arith.constant 0 : i32
    %c0_i32_0 = arith.constant 0 : i32
    return %arg0, %c0_i32 : i32, i32
  }
}

</mosaic_0001>

<bundles_post_ra>
// kernel: tpu_custom_call.1
= control target key start
LH: loop header
LB: loop body
LE: loop exit
PB: predicated region body
PF: predicated region fallthrough
CT: control target
= control target key end

     0   :  { %12 = vsyncpa [#allocation3], 0  ;;  %s800_s0 = inlined_call_operand.hbm [shape: f32[8,8], index: 0, kind: input, shape index: {}]   ;;  %s801_s1 = inlined_call_operand.hbm [shape: f32[8,128], index: 1, kind: input, shape index: {}]   ;;  %s802_s2 = inlined_call_operand.vmem [shape: f32[1,128], index: 2, kind: input, shape index: {}]   ;;  %s803_s3 = inlined_call_operand.hbm [shape: f32[128,128], index: 3, kind: input, shape index: {}]   ;;  %s804_s4 = inlined_call_operand.vmem [shape: f32[1,128], index: 4, kind: input, shape index: {}]   ;;  %s805_s5 = inlined_call_operand.hbm [shape: f32[128,128], index: 5, kind: input, shape index: {}]   ;;  %s806_s6 = inlined_call_operand.vmem [shape: f32[1,128], index: 6, kind: input, shape index: {}]   ;;  %s807_s7 = inlined_call_operand.hbm [shape: f32[8,128], index: 7, kind: output, shape index: {}]  }
   0x1   :  { %13 = vsyncpa [#allocation6], 0 }
   0x2   :  { %14 = vsyncpa [#allocation9], 0 }
   0x3   :  { %15 = vsyncpa [#allocation4], 0  ;;  %s662_s24 = smov [#allocation5]   ;;  %s663_s26 = smov [#allocation2]  }
   0x4   :  { %s32_s25 = sshll.u32 %s662_s24, 4  ;;  %s22_s27 = sshll.u32 %s663_s26, 4  ;;  %s33_s25 = int_to_ptr.vmem [resolvable:$true] %s32_s25  ;;  %s23_s27 = int_to_ptr.vmem [resolvable:$true] %s22_s27 }
   0x5   :  { %s544_s30 = scalar_lea.hbm %s801_s1, 128 }
   0x6   :  { %p545_p0 = scmp.ne.s32.totalorder %s801_s1, %s544_s30  ;;  %p548_p1 = scmp.lt.u32.totalorder %s544_s30, %s801_s1 }
   0x8   :  { %p550_p2 = pnand %p548_p1, %p545_p0 }
   0xa   :  { %553 = shalt.err (!%p550_p2)
}
   0xb   :  { %s554_s12 = scalar_lea.vmem %s33_s25, 128  ;;  %p559_p4 = scmp.lt.s32.totalorder %s33_s25, %s33_s25 }
   0xc   :  { %p555_p3 = scmp.ne.s32.totalorder %s33_s25, %s554_s12  ;;  %p560_p5 = scmp.lt.s32.totalorder %s554_s12, %s554_s12 }
   0xe   :  { %p561_p6 = por %p560_p5, %p559_p4 }
  0x10   :  { %p562_p7 = pnand %p561_p6, %p555_p3 }
  0x12   :  { %565 = shalt.err (!%p562_p7)
}
  0x13   :  { %35 = dma.hbm_to_vmem [thread:$0]  %s801_s1, 128, %s33_s25, [#allocation6]  }
  0x14   :  { %s566_s17 = scalar_lea.hbm %s800_s0, 128 }
  0x15   :  { %p567_p8 = scmp.ne.s32.totalorder %s800_s0, %s566_s17  ;;  %p570_p9 = scmp.lt.u32.totalorder %s566_s17, %s800_s0 }
  0x17   :  { %p572_p10 = pnand %p570_p9, %p567_p8 }
  0x19   :  { %575 = shalt.err (!%p572_p10)
}
  0x1a   :  { %s576_s22 = scalar_lea.vmem %s23_s27, 128  ;;  %p581_p12 = scmp.lt.s32.totalorder %s23_s27, %s23_s27 }
  0x1b   :  { %p577_p11 = scmp.ne.s32.totalorder %s23_s27, %s576_s22  ;;  %p582_p13 = scmp.lt.s32.totalorder %s576_s22, %s576_s22 }
  0x1d   :  { %p583_p0 = por %p582_p13, %p581_p12 }
  0x1f   :  { %p584_p1 = pnand %p583_p0, %p577_p11 }
  0x21   :  { %587 = shalt.err (!%p584_p1)
}
  0x22   :  { %25 = dma.hbm_to_vmem [thread:$0]  %s800_s0, 128, %s23_s27, [#allocation3]  }
  0x23   :  { %s664_s24 = smov [#allocation7]   ;;  %s588_s29 = scalar_lea.hbm %s803_s3, 2048 }
  0x24   :  { %s43_s25 = sshll.u32 %s664_s24, 4  ;;  %p589_p2 = scmp.ne.s32.totalorder %s803_s3, %s588_s29  ;;  %s44_s25 = int_to_ptr.vmem [resolvable:$true] %s43_s25 }
  0x25   :  { %p592_p3 = scmp.lt.u32.totalorder %s588_s29, %s803_s3 }
  0x27   :  { %p594_p4 = pnand %p592_p3, %p589_p2 }
  0x29   :  { %597 = shalt.err (!%p594_p4)
}
  0x2a   :  { %s598_s11 = scalar_lea.vmem %s44_s25, 2048  ;;  %p603_p6 = scmp.lt.s32.totalorder %s44_s25, %s44_s25 }
  0x2b   :  { %p599_p5 = scmp.ne.s32.totalorder %s44_s25, %s598_s11  ;;  %p604_p7 = scmp.lt.s32.totalorder %s598_s11, %s598_s11 }
  0x2d   :  { %p605_p8 = por %p604_p7, %p603_p6 }
  0x2f   :  { %p606_p9 = pnand %p605_p8, %p599_p5 }
  0x31   :  { %609 = shalt.err (!%p606_p9)
}
  0x32   :  { %s665_s0 = smov 128   ;;  %s666_s27 = smov 8  }
  0x33   :  { %49 = dma.hbm_to_vmem [thread:$0]  %s803_s3, 2048, %s44_s25, [#allocation6], %s665_s0, %s665_s0, %s666_s27  }
  0x34   :  { %s667_s14 = smov [#allocation8]   ;;  %s610_s18 = scalar_lea.hbm %s805_s5, 2048 }
  0x35   :  { %s57_s15 = sshll.u32 %s667_s14, 4  ;;  %p611_p10 = scmp.ne.s32.totalorder %s805_s5, %s610_s18  ;;  %s58_s15 = int_to_ptr.vmem [resolvable:$true] %s57_s15 }
  0x36   :  { %p614_p11 = scmp.lt.u32.totalorder %s610_s18, %s805_s5 }
  0x38   :  { %p616_p12 = pnand %p614_p11, %p611_p10 }
  0x3a   :  { %619 = shalt.err (!%p616_p12)
}
  0x3b   :  { %s620_s1 = scalar_lea.vmem %s58_s15, 2048  ;;  %p625_p0 = scmp.lt.s32.totalorder %s58_s15, %s58_s15 }
  0x3c   :  { %p621_p13 = scmp.ne.s32.totalorder %s58_s15, %s620_s1  ;;  %p626_p1 = scmp.lt.s32.totalorder %s620_s1, %s620_s1 }
  0x3e   :  { %p627_p2 = por %p626_p1, %p625_p0 }
  0x40   :  { %p628_p3 = pnand %p627_p2, %p621_p13 }
  0x42   :  { %631 = shalt.err (!%p628_p3)
}
  0x43   :  { %63 = dma.hbm_to_vmem [thread:$0]  %s805_s5, 2048, %s58_s15, [#allocation9], %s665_s0, %s665_s0, %s666_s27  }
  0x44   :  { %654 = dma.done.wait [#allocation3], 128  }
  0x45   :  { %655 = vsyncadd [#allocation3], 4294967168 }
  0x46   :  { %656 = dma.done.wait [#allocation6], 2176  }
  0x47   :  { %657 = vsyncadd [#allocation6], 4294965120 }
  0x48   :  { %658 = dma.done.wait [#allocation9], 2048  }
  0x49   :  { %659 = vsyncadd [#allocation9], 4294965248  ;;  %v668_v0 = vmov 0.0   ;;  %vm669_vm0 = vmmov 0   ;;  %v670_v1 = vmov 0.0|0.0   ;;  %vm87_vm1 = vcmask 64512  }
  0x4a   :  { %407 = vmatprep.subr.mxu0 %v668_v0  ;;  %409 = vmatprep.mubr.msk.f32.mxu0 %vm669_vm0, %v668_v0  ;;  %v79_v2 = vld [vmem:[#allocation5] sm:$0xff]  ;;  %v78_v3 = vld [vmem:[#allocation2] sm:$0xff]  ;;  %v162_v4 = vld [vmem:[#allocation7] sm:$0xff]  ;;  %s671_s29 = smov [#allocation10]  }
  0x4b   :  { %482 = vmatprep.subr.bf16.mxu1 %v670_v1  ;;  %444 = vmatprep.mubr.msk.f32.mxu1 %vm669_vm0, %v668_v0  ;;  %v163_v5 = vld [vmem:[#allocation7 + $0x8] sm:$0xff]  ;;  %v164_v6 = vld [vmem:[#allocation7 + $0x10] sm:$0xff]  ;;  %v165_v7 = vld [vmem:[#allocation7 + $0x18] sm:$0xff]  ;;  %s356_s30 = sshll.u32 %s671_s29, 4  ;;  %s357_s30 = int_to_ptr.vmem [resolvable:$true] %s356_s30 }
  0x4c   :  { %408 = vmatpush3.msra.mxu0 %v79_v2  ;;  %v483_v8 = vpack.c.bf16 %v163_v5, %v162_v4  ;;  %v486_v9 = vpack.c.bf16 %v165_v7, %v164_v6  ;;  %v166_v10 = vld [vmem:[#allocation7 + $0x20] sm:$0xff]  ;;  %v167_v11 = vld [vmem:[#allocation7 + $0x28] sm:$0xff]  ;;  %v168_v13 = vld [vmem:[#allocation7 + $0x30] sm:$0xff]  ;;  %s632_s8 = scalar_lea.vmem %s357_s30, 128  ;;  %p637_p5 = scmp.lt.s32.totalorder %s357_s30, %s357_s30 }
  0x4d   :  { %410 = vmatmul.mubr.msk.f32.vlgmr.msra.gmra.mrb[0].mxu0 %vm87_vm1, %v78_v3  ;;  %506 = vmatprep.subr.bf16.mxu0 %v670_v1  ;;  %v489_v12 = vpack.c.bf16 %v167_v11, %v166_v10  ;;  %v169_v14 = vld [vmem:[#allocation7 + $0x38] sm:$0xff]  ;;  %v170_v16 = vld [vmem:[#allocation7 + $0x40] sm:$0xff]  ;;  %v171_v17 = vld [vmem:[#allocation7 + $0x48] sm:$0xff]  ;;  %p633_p4 = scmp.ne.s32.totalorder %s357_s30, %s632_s8  ;;  %p638_p6 = scmp.lt.s32.totalorder %s632_s8, %s632_s8 }
  0x4e   :  { %479 = vmatprep.mubr.msk.f32.mxu0 %vm669_vm0, %v668_v0  ;;  %484 = vmatpush3.bf16.msra.mxu1 %v483_v8  ;;  %v492_v15 = vpack.c.bf16 %v169_v14, %v168_v13  ;;  %v495_v18 = vpack.c.bf16 %v171_v17, %v170_v16  ;;  %v172_v19 = vld [vmem:[#allocation7 + $0x50] sm:$0xff]  ;;  %v173_v20 = vld [vmem:[#allocation7 + $0x58] sm:$0xff]  ;;  %v174_v22 = vld [vmem:[#allocation7 + $0x60] sm:$0xff] }
  0x4f   :  { %485 = vmatprep.subr.bf16.mxu1 %v670_v1  ;;  %v498_v21 = vpack.c.bf16 %v173_v20, %v172_v19  ;;  %v175_v23 = vld [vmem:[#allocation7 + $0x68] sm:$0xff]  ;;  %v176_v25 = vld [vmem:[#allocation7 + $0x70] sm:$0xff]  ;;  %v177_v26 = vld [vmem:[#allocation7 + $0x78] sm:$0xff]  ;;  %p639_p7 = por %p638_p6, %p637_p5 }
  0x50   :  { %v501_v24 = vpack.c.bf16 %v175_v23, %v174_v22  ;;  %v504_v27 = vpack.c.bf16 %v177_v26, %v176_v25  ;;  %v256_v28 = vld [vmem:[#allocation8] sm:$0xff]  ;;  %v257_v29 = vld [vmem:[#allocation8 + $0x8] sm:$0xff]  ;;  %v258_v30 = vld [vmem:[#allocation8 + $0x10] sm:$0xff] }
  0x51   :  { %v507_v31 = vpack.c.bf16 %v257_v29, %v256_v28  ;;  %v259_v32 = vld [vmem:[#allocation8 + $0x18] sm:$0xff]  ;;  %v260_v34 = vld [vmem:[#allocation8 + $0x20] sm:$0xff]  ;;  %v261_v35 = vld [vmem:[#allocation8 + $0x28] sm:$0xff]  ;;  %p640_p8 = pnand %p639_p7, %p633_p4 }
  0x52   :  { %487 = vmatpush3.bf16.msra.mxu1 %v486_v9  ;;  %v510_v33 = vpack.c.bf16 %v259_v32, %v258_v30  ;;  %v513_v36 = vpack.c.bf16 %v261_v35, %v260_v34  ;;  %v262_v37 = vld [vmem:[#allocation8 + $0x30] sm:$0xff]  ;;  %v263_v38 = vld [vmem:[#allocation8 + $0x38] sm:$0xff]  ;;  %v264_v40 = vld [vmem:[#allocation8 + $0x40] sm:$0xff] }
  0x53   :  { %488 = vmatprep.subr.bf16.mxu1 %v670_v1  ;;  %508 = vmatpush3.bf16.msra.mxu0 %v507_v31  ;;  %v516_v39 = vpack.c.bf16 %v263_v38, %v262_v37  ;;  %v265_v41 = vld [vmem:[#allocation8 + $0x48] sm:$0xff]  ;;  %v367_v43 = vld [vmem:[%s802_s2] ss:$0 sm:$0xff]  ;;  %v267_v49 = vld [vmem:[#allocation8 + $0x58] sm:$0xff] }
  0x54   :  { %509 = vmatprep.subr.bf16.mxu0 %v670_v1  ;;  %v519_v42 = vpack.c.bf16 %v265_v41, %v264_v40  ;;  %v266_v48 = vld [vmem:[#allocation8 + $0x50] sm:$0xff]  ;;  %v268_v51 = vld [vmem:[#allocation8 + $0x60] sm:$0xff]  ;;  %v269_v52 = vld [vmem:[#allocation8 + $0x68] sm:$0xff] }
  0x55   :  { %v522_v50 = vpack.c.bf16 %v267_v49, %v266_v48  ;;  %v525_v53 = vpack.c.bf16 %v269_v52, %v268_v51  ;;  %v270_v54 = vld [vmem:[#allocation8 + $0x70] sm:$0xff]  ;;  %v271_v55 = vld [vmem:[#allocation8 + $0x78] sm:$0xff] }
  0x56   :  { %490 = vmatpush3.bf16.msra.mxu1 %v489_v12  ;;  %v528_v56 = vpack.c.bf16 %v271_v55, %v270_v54  ;;  %v369_v57 = vld [vmem:[%s804_s4] ss:$0 sm:$0xff] }
  0x57   :  { %491 = vmatprep.subr.bf16.mxu1 %v670_v1  ;;  %511 = vmatpush3.bf16.msra.mxu0 %v510_v33  ;;  %v370_v62 = vld [vmem:[%s806_s6] ss:$0 sm:$0xff] }
  0x58   :  { %512 = vmatprep.subr.bf16.mxu0 %v670_v1 }
  0x5a   :  { %493 = vmatpush3.bf16.msra.mxu1 %v492_v15 }
  0x5b   :  { %494 = vmatprep.subr.bf16.mxu1 %v670_v1  ;;  %514 = vmatpush3.bf16.msra.mxu0 %v513_v36 }
  0x5c   :  { %515 = vmatprep.subr.bf16.mxu0 %v670_v1 }
  0x5e   :  { %496 = vmatpush3.bf16.msra.mxu1 %v495_v18 }
  0x5f   :  { %497 = vmatprep.subr.bf16.mxu1 %v670_v1  ;;  %517 = vmatpush3.bf16.msra.mxu0 %v516_v39 }
  0x60   :  { %518 = vmatprep.subr.bf16.mxu0 %v670_v1 }
  0x62   :  { %499 = vmatpush3.bf16.msra.mxu1 %v498_v21 }
  0x63   :  { %500 = vmatprep.subr.bf16.mxu1 %v670_v1  ;;  %520 = vmatpush3.bf16.msra.mxu0 %v519_v42 }
  0x64   :  { %521 = vmatprep.subr.bf16.mxu0 %v670_v1 }
  0x66   :  { %502 = vmatpush3.bf16.msra.mxu1 %v501_v24 }
  0x67   :  { %503 = vmatprep.subr.bf16.mxu1 %v670_v1  ;;  %523 = vmatpush3.bf16.msra.mxu0 %v522_v50 }
  0x68   :  { %524 = vmatprep.subr.bf16.mxu0 %v670_v1 }
  0x6a   :  { %505 = vmatpush3.bf16.msra.mxu1 %v504_v27 }
  0x6b   :  { %526 = vmatpush3.bf16.msra.mxu0 %v525_v53 }
  0x6c   :  { %527 = vmatprep.subr.bf16.mxu0 %v670_v1 }
  0x6f   :  { %529 = vmatpush3.bf16.msra.mxu0 %v528_v56 }
 0x120   :  { %v157_v44 = vpop.f32.mrb[0].mxu0 }
 0x121   :  { %v158_v45 = vadd.f32 %v367_v43, %v157_v44  ;;  %v411_v46 = vpop.f32.mrb[1].mxu0 }
 0x123   :  { %540 = vtanh.f32 %v158_v45 }
 0x12d   :  { %v541_v47 = vpop.eup %540 }
 0x12e   :  { %445 = vmatmul.mubr.f32.vlgmr.msra.gmra.mrb[0].mxu1 %v541_v47 }
 0x201   :  { %v251_v58 = vpop.f32.mrb[0].mxu1 }
 0x202   :  { %v252_v59 = vadd.f32 %v369_v57, %v251_v58  ;;  %v446_v60 = vpop.f32.mrb[1].mxu1 }
 0x204   :  { %542 = vtanh.f32 %v252_v59 }
 0x20e   :  { %v543_v61 = vpop.eup %542 }
 0x20f   :  { %480 = vmatmul.mubr.f32.vlgmr.msra.gmra.mrb[2].mxu0 %v543_v61 }
 0x2e2   :  { %v345_v63 = vpop.f32.mrb[2].mxu0 }
 0x2e3   :  { %v346_v0 = vadd.f32 %v370_v62, %v345_v63  ;;  %v481_v1 = vpop.f32.mrb[3].mxu0 }
 0x2e5   :  { %349 = vst [vmem:[#allocation10] sm:$0xff] %v346_v0 }
 0x2e6   :  { %643 = shalt.err (!%p640_p8)
}
 0x2e7   :  { %s644_s10 = scalar_lea.hbm %s807_s7, 128 }
 0x2e8   :  { %p645_p9 = scmp.ne.s32.totalorder %s807_s7, %s644_s10  ;;  %p648_p10 = scmp.lt.u32.totalorder %s644_s10, %s807_s7 }
 0x2ea   :  { %p650_p11 = pnand %p648_p10, %p645_p9 }
 0x2ec   :  { %653 = shalt.err (!%p650_p11)
}
 0x2ed   :  { %359 = dma.vmem_to_hbm [thread:$0]  %s357_s30, 128, %s807_s7, [#allocation4]  }
 0x2ee   :  { %660 = dma.done.wait [#allocation4], 128  }
 0x2ef   :  { %661 = vsyncadd [#allocation4], 4294967168 }
 0x2f0   :  { %363 = vsyncpa [#allocation3], 1 }
 0x2f1   :  { %364 = vsyncpa [#allocation6], 1 }
 0x2f2   :  { %365 = vsyncpa [#allocation9], 1 }
 0x2f3   :  { %366 = vsyncpa [#allocation4], 1 }

</bundles_post_ra>
